<compile_context>
chip_gen: v7x
topology: tpu7x:2x2x1
jax: 0.10.0
libtpu: 0.0.40
codegen_flags: <defaults>
</compile_context>

<pallas_src>
import functools
import math

import jax
import jax.numpy as jnp
from jax.experimental import pallas as pl
from jax.experimental.pallas import tpu as pltpu

LANE = 128
_HALF_LOG_2PI = 0.5 * math.log(2.0 * math.pi)


def _round_up(x, m):
    return (x + m - 1) // m * m


# ----------------------------------------------------------------------------- kernel
def vmf_kernel(x_ref, w1_ref, b1_ref, w2_ref, b2_ref, w3_ref, b3_ref, eps_ref,
               z_ref, logq_ref, *, latent_size, lp, n_samples):
    # Hoisted bias reads (one load each, no per-use re-broadcast).
    b1 = b1_ref[...]                                                  # (1, hid_p) f32
    b2 = b2_ref[...]
    b3 = b3_ref[...]                                                  # (1, 2*lp)  f32

    # ---- inference network: bf16 MXU operands, f32 accumulation / elementwise ----
    h = jnp.dot(x_ref[...], w1_ref[...], preferred_element_type=jnp.float32)
    h = jnp.maximum(h + b1, 0.0)
    h = jnp.dot(h.astype(w2_ref.dtype), w2_ref[...], preferred_element_type=jnp.float32)
    h = jnp.maximum(h + b2, 0.0)
    net = jnp.dot(h.astype(w3_ref.dtype), w3_ref[...],
                  preferred_element_type=jnp.float32) + b3            # (bb, 2*lp)

    bb = net.shape[0]
    loc = net[:, 0 * lp:1 * lp]                                       # (bb, lp)
    scale_arg = net[:, 1 * lp:2 * lp]

    # Numerically-stable softplus; clamp away exact 0 so log(scale) stays finite.
    scale = jnp.maximum(scale_arg, 0.0) + jnp.log1p(jnp.exp(-jnp.abs(scale_arg)))
    scale = jnp.maximum(scale, 1e-30)

    # log q(z0) = -0.5*log(2*pi) - log(scale) - 0.5*eps^2   (since z0 - loc == scale*eps)
    # Only the first `latent_size` lanes are real -> mask the 2D per-row term once.
    lane = jax.lax.broadcasted_iota(jnp.int32, (bb, lp), dimension=1)
    row_term = jnp.where(lane < latent_size, -_HALF_LOG_2PI - jnp.log(scale), 0.0)
    row_sum = jnp.sum(row_term, axis=-1, keepdims=True)               # (bb, 1)

    if n_samples > 1:
        # Expand per-batch stats to the flattened (batch, sample) row axis.
        rows = bb * n_samples
        loc = jnp.broadcast_to(loc[:, None, :], (bb, n_samples, lp)).reshape(rows, lp)
        scale = jnp.broadcast_to(scale[:, None, :], (bb, n_samples, lp)).reshape(rows, lp)
        row_sum = jnp.broadcast_to(row_sum[:, None, :], (bb, n_samples, 1)).reshape(rows, 1)

    eps = eps_ref[...].astype(jnp.float32)                            # (rows, lp); padded lanes are 0
    z0 = loc + scale * eps                                            # reparameterized sample
    logq = row_sum - 0.5 * jnp.sum(eps * eps, axis=-1, keepdims=True)  # (rows, 1)

    z_ref[...] = z0.astype(z_ref.dtype)
    # Lane-dense (rows, 128) store -> unmasked vst; lane 0 is sliced out in the wrapper.
    logq_ref[...] = jnp.broadcast_to(logq, (logq.shape[0], LANE)).astype(logq_ref.dtype)


# ----------------------------------------------------------------------------- params
def init_linear_params(key, in_features, out_features, dtype=jnp.float32):
    """PyTorch nn.Linear default init; weight stored transposed (in, out)."""
    kw, kb = jax.random.split(key)
    bound = 1.0 / math.sqrt(in_features)
    w = jax.random.uniform(kw, (in_features, out_features), dtype, -bound, bound)
    b = jax.random.uniform(kb, (1, out_features), dtype, -bound, bound)
    return w, b


def prepare_params(params, data_size, latent_size, mxu_dtype=jnp.bfloat16):
    """Zero-pad weights to lane-dense (multiple-of-128) shapes. Only the loc and
    scale_arg slabs of layer 3 are kept (the h_ctx slab only feeds the flow, which
    is identity here); each slab gets its own 128-lane-aligned region. Weights are
    stored bf16 (MXU-native, halves DMA bytes), biases f32."""
    w1, b1, w2, b2, w3, b3 = params
    hidden = w1.shape[1]
    in_p = _round_up(data_size, LANE)
    hid_p = _round_up(hidden, LANE)
    lp = _round_up(latent_size, LANE)

    w1p = jnp.zeros((in_p, hid_p), jnp.float32).at[:data_size, :hidden].set(w1)
    b1p = jnp.zeros((1, hid_p), jnp.float32).at[:, :hidden].set(b1)
    w2p = jnp.zeros((hid_p, hid_p), jnp.float32).at[:hidden, :hidden].set(w2)
    b2p = jnp.zeros((1, hid_p), jnp.float32).at[:, :hidden].set(b2)
    w3p = jnp.zeros((hid_p, 2 * lp), jnp.float32)
    b3p = jnp.zeros((1, 2 * lp), jnp.float32)
    for j in range(2):                       # 0: loc, 1: scale_arg (h_ctx dropped)
        w3p = w3p.at[:hidden, j * lp:j * lp + latent_size].set(
            w3[:, j * latent_size:(j + 1) * latent_size])
        b3p = b3p.at[:, j * lp:j * lp + latent_size].set(
            b3[:, j * latent_size:(j + 1) * latent_size])
    return (w1p.astype(mxu_dtype), b1p,
            w2p.astype(mxu_dtype), b2p,
            w3p.astype(mxu_dtype), b3p)


# ----------------------------------------------------------------------------- wrapper
@functools.partial(jax.jit, static_argnames=("latent_size", "block_b"))
def vmf_forward(x, eps, padded_params, *, latent_size, block_b=None):
    """Returns (z_T, log_q_z): z_T (B, n_samples, latent), log_q_z (B, n_samples, 1)."""
    w1, b1, w2, b2, w3, b3 = padded_params
    B, data_size = x.shape
    _, n_samples, _ = eps.shape
    in_p, hid_p = w1.shape
    lp = w3.shape[1] // 2

    # Lane-dense bf16 inputs (halves x/eps HBM->VMEM bytes; MXU input is bf16 anyway,
    # eps is noise so bf16 precision is plenty; all math stays f32 in-kernel).
    xp = jnp.zeros((B, in_p), jnp.bfloat16).at[:, :data_size].set(x.astype(jnp.bfloat16))
    epsp = (jnp.zeros((B * n_samples, lp), jnp.bfloat16)
            .at[:, :latent_size]
            .set(eps.reshape(B * n_samples, latent_size).astype(jnp.bfloat16)))

    if block_b is None:
        # Feed the MXU / amortize the ~0.35us per-step overhead; >=2 steps also lets
        # v7x shard the "parallel" axis across its two TensorCores.
        block_b = B
        for cand in (512, 256, 128):
            if B > cand and B % cand == 0:
                block_b = cand
                break
    assert B % block_b == 0
    grid = (B // block_b,)
    rows_blk = block_b * n_samples

    weight_bytes = (w1.size + w2.size + w3.size) * w1.dtype.itemsize
    # Weights are grid-invariant; single-buffer them once big enough that default
    # double-buffering would crowd v7x's 64 MiB VMEM (no refetch needed -> no cost).
    single_buffer_weights = weight_bytes > (8 << 20)

    def w_spec(shape):
        if single_buffer_weights:
            return pl.BlockSpec(shape, lambda i: (0, 0), pipeline_mode=pl.Buffered(1))
        return pl.BlockSpec(shape, lambda i: (0, 0))

    act_bytes = (block_b * in_p * 2 + rows_blk * lp * 2          # x, eps (bf16)
                 + rows_blk * lp * 4 + rows_blk * LANE * 4)      # z, log_q (f32)
    bias_bytes = (2 * hid_p + 2 * lp) * 4
    vmem_need = (2 * (act_bytes + bias_bytes)
                 + (1 if single_buffer_weights else 2) * weight_bytes)
    vmem_limit = int(min(max(2 * vmem_need, 16 << 20), 48 << 20))

    flops = 2 * B * (in_p * hid_p + hid_p * hid_p + hid_p * 2 * lp)
    transcendentals = 3 * B * lp + B * n_samples * lp            # exp/log1p/log (+ eps^2 is VPU)
    bytes_accessed = (xp.size * 2 + epsp.size * 2 + weight_bytes + bias_bytes
                      + B * n_samples * (lp + LANE) * 4)

    kernel = functools.partial(vmf_kernel, latent_size=latent_size, lp=lp,
                               n_samples=n_samples)

    z_pad, logq_pad = pl.pallas_call(
        kernel,
        out_shape=(
            jax.ShapeDtypeStruct((B * n_samples, lp), jnp.float32),
            jax.ShapeDtypeStruct((B * n_samples, LANE), jnp.float32),
        ),
        grid_spec=pltpu.PrefetchScalarGridSpec(
            num_scalar_prefetch=0,
            grid=grid,
            in_specs=[
                pl.BlockSpec((block_b, in_p), lambda i: (i, 0)),       # x (bf16)
                w_spec((in_p, hid_p)),                                 # W1 (resident)
                pl.BlockSpec((1, hid_p), lambda i: (0, 0)),            # b1
                w_spec((hid_p, hid_p)),                                # W2 (resident)
                pl.BlockSpec((1, hid_p), lambda i: (0, 0)),            # b2
                w_spec((hid_p, 2 * lp)),                               # W3 (loc|scale slabs)
                pl.BlockSpec((1, 2 * lp), lambda i: (0, 0)),           # b3
                pl.BlockSpec((rows_blk, lp), lambda i: (i, 0)),        # eps (bf16, flattened rows)
            ],
            out_specs=(
                pl.BlockSpec((rows_blk, lp), lambda i: (i, 0)),        # z (lane-dense)
                pl.BlockSpec((rows_blk, LANE), lambda i: (i, 0)),      # log_q (lane-dense)
            ),
        ),
        compiler_params=pltpu.CompilerParams(
            dimension_semantics=("parallel",),
            vmem_limit_bytes=vmem_limit,
        ),
        cost_estimate=pl.CostEstimate(flops=flops, transcendentals=transcendentals,
                                      bytes_accessed=bytes_accessed),
    )(xp, w1, b1, w2, b2, w3, b3, epsp)

    z = z_pad.reshape(B, n_samples, lp)[:, :, :latent_size]
    log_q_z = logq_pad[:, :1].reshape(B, n_samples, 1)                 # keepdim=True as in module
    return z, log_q_z


# ----------------------------------------------------------------------------- reference
def reference_forward(x, eps, params, latent_size, mxu_dtype=jnp.bfloat16):
    """Pure-JAX reference mirroring the kernel's numerics (bf16 dot operands / bf16 eps
    transfer, f32 math) and the module's original log-prob formula."""
    w1, b1, w2, b2, w3, b3 = params

    def dot(a, w):
        return jnp.dot(a.astype(mxu_dtype), w.astype(mxu_dtype),
                       preferred_element_type=jnp.float32)

    h = jnp.maximum(dot(x, w1) + b1, 0.0)
    h = jnp.maximum(dot(h, w2) + b2, 0.0)
    net = dot(h, w3) + b3                                             # (B, 3L)

    L = latent_size
    loc = net[:, None, :L]
    scale_arg = net[:, None, L:2 * L]
    scale = jnp.maximum(scale_arg, 0.0) + jnp.log1p(jnp.exp(-jnp.abs(scale_arg)))
    eps32 = eps.astype(mxu_dtype).astype(jnp.float32)                 # kernel transfers eps in bf16
    z0 = loc + scale * eps32
    var = scale * scale
    log_q0 = -0.5 * jnp.log(2.0 * math.pi * var) - (z0 - loc) ** 2 / (2.0 * var)
    log_q_z = jnp.sum(log_q0, axis=-1, keepdims=True)
    return z0, log_q_z


# ----------------------------------------------------------------------------- main
if __name__ == "__main__":
    # Shapes consistent with VaritionalMeanField: hidden = 2*latent, MLP output = 3*latent.
    latent_size, data_size, batch, n_samples = 16, 64, 16, 1
    hidden_size = latent_size * 2

    key = jax.random.PRNGKey(0)
    kx, keps, k1, k2, k3 = jax.random.split(key, 5)

    x = jax.random.normal(kx, (batch, data_size), jnp.float32)
    eps = jax.random.normal(keps, (batch, n_samples, latent_size), jnp.float32)

    w1, b1 = init_linear_params(k1, data_size, hidden_size)
    w2, b2 = init_linear_params(k2, hidden_size, hidden_size)
    w3, b3 = init_linear_params(k3, hidden_size, latent_size * 3)
    params = (w1, b1, w2, b2, w3, b3)

    padded = prepare_params(params, data_size, latent_size)

    z, log_q_z = vmf_forward(x, eps, padded, latent_size=latent_size)
    z, log_q_z = jax.block_until_ready((z, log_q_z))

    z_ref, log_q_ref = reference_forward(x, eps, params, latent_size)

    assert z.shape == (batch, n_samples, latent_size)
    assert log_q_z.shape == (batch, n_samples, 1)
    assert jnp.allclose(z, z_ref, atol=1e-3, rtol=1e-3), "z mismatch vs reference"
    assert jnp.allclose(log_q_z, log_q_ref, atol=1e-3, rtol=1e-3), "log_q_z mismatch vs reference"

    print("KERNEL_OK")
</pallas_src>

<mosaic_0001>
module attributes {stable_mosaic.version = 11 : i64} {
  func.func @vmf_kernel(%arg0: i32, %arg1: memref<16x128xbf16, #tpu.memory_space<vmem>>, %arg2: memref<128x128xbf16, #tpu.memory_space<vmem>>, %arg3: memref<1x128xf32, #tpu.memory_space<vmem>>, %arg4: memref<128x128xbf16, #tpu.memory_space<vmem>>, %arg5: memref<1x128xf32, #tpu.memory_space<vmem>>, %arg6: memref<128x256xbf16, #tpu.memory_space<vmem>>, %arg7: memref<1x256xf32, #tpu.memory_space<vmem>>, %arg8: memref<16x128xbf16, #tpu.memory_space<vmem>>, %arg9: memref<16x128xf32, #tpu.memory_space<vmem>>, %arg10: memref<16x128xf32, #tpu.memory_space<vmem>>) attributes {dimension_semantics = [#tpu.dimension_semantics<parallel>], iteration_bounds = array<i64: 1>, scalar_prefetch = 0 : i64, scratch_operands = 0 : i64, tpu.core_type = #tpu.core_type<tc>, window_params = [{transform_indices = @transform_0, window_bounds = array<i64: 16, 128>}, {pipeline_mode = #tpu.pipeline_mode<synchronous>, transform_indices = @transform_1, window_bounds = array<i64: 128, 128>}, {pipeline_mode = #tpu.pipeline_mode<synchronous>, transform_indices = @transform_2, window_bounds = array<i64: 1, 128>}, {pipeline_mode = #tpu.pipeline_mode<synchronous>, transform_indices = @transform_3, window_bounds = array<i64: 128, 128>}, {pipeline_mode = #tpu.pipeline_mode<synchronous>, transform_indices = @transform_4, window_bounds = array<i64: 1, 128>}, {pipeline_mode = #tpu.pipeline_mode<synchronous>, transform_indices = @transform_5, window_bounds = array<i64: 128, 256>}, {pipeline_mode = #tpu.pipeline_mode<synchronous>, transform_indices = @transform_6, window_bounds = array<i64: 1, 256>}, {transform_indices = @transform_7, window_bounds = array<i64: 16, 128>}, {transform_indices = @transform_8, window_bounds = array<i64: 16, 128>}, {transform_indices = @transform_9, window_bounds = array<i64: 16, 128>}]} {
    %c0 = arith.constant 0 : index
    %c0_0 = arith.constant 0 : index
    %0 = vector.load %arg3[%c0, %c0_0] : memref<1x128xf32, #tpu.memory_space<vmem>>, vector<1x128xf32>
    %c0_1 = arith.constant 0 : index
    %c0_2 = arith.constant 0 : index
    %1 = vector.load %arg5[%c0_1, %c0_2] : memref<1x128xf32, #tpu.memory_space<vmem>>, vector<1x128xf32>
    %c0_3 = arith.constant 0 : index
    %c0_4 = arith.constant 0 : index
    %2 = vector.load %arg7[%c0_3, %c0_4] : memref<1x256xf32, #tpu.memory_space<vmem>>, vector<1x256xf32>
    %c0_5 = arith.constant 0 : index
    %c0_6 = arith.constant 0 : index
    %3 = vector.load %arg1[%c0_5, %c0_6] : memref<16x128xbf16, #tpu.memory_space<vmem>>, vector<16x128xbf16>
    %c0_7 = arith.constant 0 : index
    %c0_8 = arith.constant 0 : index
    %4 = vector.load %arg2[%c0_7, %c0_8] : memref<128x128xbf16, #tpu.memory_space<vmem>>, vector<128x128xbf16>
    %cst = arith.constant dense<0.000000e+00> : vector<16x128xf32>
    %5 = tpu.matmul %3, %4, %cst {dimension_numbers = #tpu.dot_dimension_numbers<[1], [0], [0], [1], [0, 0, 1, 1], [], []>} : vector<16x128xbf16>, vector<128x128xbf16>, vector<16x128xf32> -> vector<16x128xf32>
    %6 = vector.broadcast %0 : vector<1x128xf32> to vector<16x128xf32>
    %7 = arith.addf %5, %6 : vector<16x128xf32>
    %cst_9 = arith.constant 0.000000e+00 : f32
    %8 = vector.broadcast %cst_9 : f32 to vector<16x128xf32>
    %9 = arith.maximumf %7, %8 : vector<16x128xf32>
    %10 = arith.truncf %9 : vector<16x128xf32> to vector<16x128xbf16>
    %c0_10 = arith.constant 0 : index
    %c0_11 = arith.constant 0 : index
    %11 = vector.load %arg4[%c0_10, %c0_11] : memref<128x128xbf16, #tpu.memory_space<vmem>>, vector<128x128xbf16>
    %cst_12 = arith.constant dense<0.000000e+00> : vector<16x128xf32>
    %12 = tpu.matmul %10, %11, %cst_12 {dimension_numbers = #tpu.dot_dimension_numbers<[1], [0], [0], [1], [0, 0, 1, 1], [], []>} : vector<16x128xbf16>, vector<128x128xbf16>, vector<16x128xf32> -> vector<16x128xf32>
    %13 = vector.broadcast %1 : vector<1x128xf32> to vector<16x128xf32>
    %14 = arith.addf %12, %13 : vector<16x128xf32>
    %cst_13 = arith.constant 0.000000e+00 : f32
    %15 = vector.broadcast %cst_13 : f32 to vector<16x128xf32>
    %16 = arith.maximumf %14, %15 : vector<16x128xf32>
    %17 = arith.truncf %16 : vector<16x128xf32> to vector<16x128xbf16>
    %c0_14 = arith.constant 0 : index
    %c0_15 = arith.constant 0 : index
    %18 = vector.load %arg6[%c0_14, %c0_15] : memref<128x256xbf16, #tpu.memory_space<vmem>>, vector<128x256xbf16>
    %cst_16 = arith.constant dense<0.000000e+00> : vector<16x256xf32>
    %19 = tpu.matmul %17, %18, %cst_16 {dimension_numbers = #tpu.dot_dimension_numbers<[1], [0], [0], [1], [0, 0, 1, 1], [], []>} : vector<16x128xbf16>, vector<128x256xbf16>, vector<16x256xf32> -> vector<16x256xf32>
    %20 = vector.broadcast %2 : vector<1x256xf32> to vector<16x256xf32>
    %21 = arith.addf %19, %20 : vector<16x256xf32>
    %22 = vector.extract_strided_slice %21 {offsets = [0, 0], sizes = [16, 128], strides = [1, 1]} : vector<16x256xf32> to vector<16x128xf32>
    %23 = vector.extract_strided_slice %21 {offsets = [0, 128], sizes = [16, 128], strides = [1, 1]} : vector<16x256xf32> to vector<16x128xf32>
    %cst_17 = arith.constant 0.000000e+00 : f32
    %24 = vector.broadcast %cst_17 : f32 to vector<16x128xf32>
    %25 = arith.maximumf %23, %24 : vector<16x128xf32>
    %26 = math.absf %23 : vector<16x128xf32>
    %cst_18 = arith.constant 0.000000e+00 : f32
    %27 = vector.broadcast %cst_18 : f32 to vector<16x128xf32>
    %28 = arith.subf %27, %26 : vector<16x128xf32>
    %29 = math.exp %28 : vector<16x128xf32>
    %30 = math.log1p %29 : vector<16x128xf32>
    %31 = arith.addf %25, %30 : vector<16x128xf32>
    %cst_19 = arith.constant 1.000000e-30 : f32
    %32 = vector.broadcast %cst_19 : f32 to vector<16x128xf32>
    %33 = arith.maximumf %31, %32 : vector<16x128xf32>
    %34 = tpu.iota {dimensions = array<i32: 1>} : vector<16x128xi32>
    %c16_i32 = arith.constant 16 : i32
    %35 = vector.broadcast %c16_i32 : i32 to vector<16x128xi32>
    %36 = arith.cmpi slt, %34, %35 : vector<16x128xi32>
    %37 = math.log %33 : vector<16x128xf32>
    %cst_20 = arith.constant -0.918938517 : f32
    %38 = vector.broadcast %cst_20 : f32 to vector<16x128xf32>
    %39 = arith.subf %38, %37 : vector<16x128xf32>
    %cst_21 = arith.constant 0.000000e+00 : f32
    %40 = vector.broadcast %cst_21 : f32 to vector<16x128xf32>
    %41 = arith.select %36, %39, %40 : vector<16x128xi1>, vector<16x128xf32>
    %cst_22 = arith.constant dense<0.000000e+00> : vector<16xf32>
    %42 = vector.multi_reduction <add>, %41, %cst_22 [1] : vector<16x128xf32> to vector<16xf32>
    %43 = vector.shape_cast %42 : vector<16xf32> to vector<16x1xf32>
    %c0_23 = arith.constant 0 : index
    %c0_24 = arith.constant 0 : index
    %44 = vector.load %arg8[%c0_23, %c0_24] : memref<16x128xbf16, #tpu.memory_space<vmem>>, vector<16x128xbf16>
    %45 = arith.extf %44 : vector<16x128xbf16> to vector<16x128xf32>
    %46 = arith.mulf %33, %45 : vector<16x128xf32>
    %47 = arith.addf %22, %46 : vector<16x128xf32>
    %48 = arith.mulf %45, %45 : vector<16x128xf32>
    %cst_25 = arith.constant dense<0.000000e+00> : vector<16xf32>
    %49 = vector.multi_reduction <add>, %48, %cst_25 [1] : vector<16x128xf32> to vector<16xf32>
    %50 = vector.shape_cast %49 : vector<16xf32> to vector<16x1xf32>
    %cst_26 = arith.constant 5.000000e-01 : f32
    %51 = vector.broadcast %cst_26 : f32 to vector<16x1xf32>
    %52 = arith.mulf %51, %50 : vector<16x1xf32>
    %53 = arith.subf %43, %52 : vector<16x1xf32>
    %c0_27 = arith.constant 0 : index
    %c0_28 = arith.constant 0 : index
    %54 = vector.load %arg9[%c0_27, %c0_28] : memref<16x128xf32, #tpu.memory_space<vmem>>, vector<16x128xf32>
    tpu.vector_store %arg9[%c0_27, %c0_28], %47 {strides = array<i32>} : memref<16x128xf32, #tpu.memory_space<vmem>>, vector<16x128xf32>,
    %55 = vector.shape_cast %53 : vector<16x1xf32> to vector<16x1xf32>
    %56 = vector.broadcast %55 : vector<16x1xf32> to vector<16x128xf32>
    %c0_29 = arith.constant 0 : index
    %c0_30 = arith.constant 0 : index
    %57 = vector.load %arg10[%c0_29, %c0_30] : memref<16x128xf32, #tpu.memory_space<vmem>>, vector<16x128xf32>
    tpu.vector_store %arg10[%c0_29, %c0_30], %56 {strides = array<i32>} : memref<16x128xf32, #tpu.memory_space<vmem>>, vector<16x128xf32>,
    return
  }
  func.func @transform_0(%arg0: i32) -> (i32, i32) {
    %c0_i32 = arith.constant 0 : i32
    %c0_i32_0 = arith.constant 0 : i32
    return %arg0, %c0_i32 : i32, i32
  }
  func.func @transform_1(%arg0: i32) -> (i32, i32) {
    %c0_i32 = arith.constant 0 : i32
    %c0_i32_0 = arith.constant 0 : i32
    %c0_i32_1 = arith.constant 0 : i32
    return %c0_i32, %c0_i32_0 : i32, i32
  }
  func.func @transform_2(%arg0: i32) -> (i32, i32) {
    %c0_i32 = arith.constant 0 : i32
    %c0_i32_0 = arith.constant 0 : i32
    %c0_i32_1 = arith.constant 0 : i32
    return %c0_i32, %c0_i32_0 : i32, i32
  }
  func.func @transform_3(%arg0: i32) -> (i32, i32) {
    %c0_i32 = arith.constant 0 : i32
    %c0_i32_0 = arith.constant 0 : i32
    %c0_i32_1 = arith.constant 0 : i32
    return %c0_i32, %c0_i32_0 : i32, i32
  }
  func.func @transform_4(%arg0: i32) -> (i32, i32) {
    %c0_i32 = arith.constant 0 : i32
    %c0_i32_0 = arith.constant 0 : i32
    %c0_i32_1 = arith.constant 0 : i32
    return %c0_i32, %c0_i32_0 : i32, i32
  }
  func.func @transform_5(%arg0: i32) -> (i32, i32) {
    %c0_i32 = arith.constant 0 : i32
    %c0_i32_0 = arith.constant 0 : i32
    %c0_i32_1 = arith.constant 0 : i32
    return %c0_i32, %c0_i32_0 : i32, i32
  }
  func.func @transform_6(%arg0: i32) -> (i32, i32) {
    %c0_i32 = arith.constant 0 : i32
    %c0_i32_0 = arith.constant 0 : i32
    %c0_i32_1 = arith.constant 0 : i32
    return %c0_i32, %c0_i32_0 : i32, i32
  }
  func.func @transform_7(%arg0: i32) -> (i32, i32) {
    %c0_i32 = arith.constant 0 : i32
    %c0_i32_0 = arith.constant 0 : i32
    return %arg0, %c0_i32 : i32, i32
  }
  func.func @transform_8(%arg0: i32) -> (i32, i32) {
    %c0_i32 = arith.constant 0 : i32
    %c0_i32_0 = arith.constant 0 : i32
    return %arg0, %c0_i32 : i32, i32
  }
  func.func @transform_9(%arg0: i32) -> (i32, i32) {
    %c0_i32 = arith.constant 0 : i32
    %c0_i32_0 = arith.constant 0 : i32
    return %arg0, %c0_i32 : i32, i32
  }
}

</mosaic_0001>

<bundles_post_ra>
// kernel: vmf_forward.1
= control target key start
LH: loop header
LB: loop body
LE: loop exit
PB: predicated region body
PF: predicated region fallthrough
CT: control target
= control target key end

     0   :  { %15 = vsyncpa [#allocation3], 0  ;;  %s920_s0 = inlined_call_operand.vmem [shape: bf16[16,128], index: 0, kind: input, shape index: {}]   ;;  %s921_s1 = inlined_call_operand.vmem [shape: bf16[128,128], index: 1, kind: input, shape index: {}]   ;;  %s922_s2 = inlined_call_operand.vmem [shape: f32[1,128], index: 2, kind: input, shape index: {}]   ;;  %s923_s3 = inlined_call_operand.hbm [shape: bf16[128,128], index: 3, kind: input, shape index: {}]   ;;  %s924_s4 = inlined_call_operand.vmem [shape: f32[1,128], index: 4, kind: input, shape index: {}]   ;;  %s925_s5 = inlined_call_operand.hbm [shape: bf16[128,256], index: 5, kind: input, shape index: {}]   ;;  %s926_s6 = inlined_call_operand.vmem [shape: f32[1,256], index: 6, kind: input, shape index: {}]   ;;  %s927_s7 = inlined_call_operand.vmem [shape: bf16[16,128], index: 7, kind: input, shape index: {}]   ;;  %s928_s8 = inlined_call_operand.hbm [shape: f32[16,128], index: 8, kind: output, shape index: {0}]   ;;  %s929_s9 = inlined_call_operand.vmem [shape: f32[16,128], index: 9, kind: output, shape index: {1}]  }
   0x1   :  { %16 = vsyncpa [#allocation6], 0 }
   0x2   :  { %17 = vsyncpa [#allocation4], 0  ;;  %s773_s30 = smov [#allocation2]   ;;  %s701_s13 = scalar_lea.hbm %s923_s3, 1024 }
   0x3   :  { %s29_s10 = sshll.u32 %s773_s30, 4  ;;  %p702_p0 = scmp.ne.s32.totalorder %s923_s3, %s701_s13  ;;  %s30_s10 = int_to_ptr.vmem [resolvable:$true] %s29_s10 }
   0x4   :  { %p705_p1 = scmp.lt.u32.totalorder %s701_s13, %s923_s3 }
   0x6   :  { %p707_p2 = pnand %p705_p1, %p702_p0 }
   0x8   :  { %710 = shalt.err (!%p707_p2)
}
   0x9   :  { %s711_s18 = scalar_lea.vmem %s30_s10, 1024  ;;  %p716_p4 = scmp.lt.s32.totalorder %s30_s10, %s30_s10 }
   0xa   :  { %p712_p3 = scmp.ne.s32.totalorder %s30_s10, %s711_s18  ;;  %p717_p5 = scmp.lt.s32.totalorder %s711_s18, %s711_s18 }
   0xc   :  { %p718_p6 = por %p717_p5, %p716_p4 }
   0xe   :  { %p719_p7 = pnand %p718_p6, %p712_p3 }
  0x10   :  { %722 = shalt.err (!%p719_p7)
}
  0x11   :  { %s774_s19 = smov 64   ;;  %s775_s20 = smov 4  }
  0x12   :  { %35 = dma.hbm_to_vmem [thread:$0]  %s923_s3, 1024, %s30_s10, [#allocation3], %s774_s19, %s774_s19, %s775_s20  }
  0x13   :  { %s776_s23 = smov [#allocation5]   ;;  %s723_s27 = scalar_lea.hbm %s925_s5, 2048 }
  0x14   :  { %s43_s24 = sshll.u32 %s776_s23, 4  ;;  %p724_p8 = scmp.ne.s32.totalorder %s925_s5, %s723_s27  ;;  %s44_s24 = int_to_ptr.vmem [resolvable:$true] %s43_s24 }
  0x15   :  { %p727_p9 = scmp.lt.u32.totalorder %s723_s27, %s925_s5 }
  0x17   :  { %p729_p10 = pnand %p727_p9, %p724_p8 }
  0x19   :  { %732 = shalt.err (!%p729_p10)
}
  0x1a   :  { %s733_s12 = scalar_lea.vmem %s44_s24, 2048  ;;  %p738_p12 = scmp.lt.s32.totalorder %s44_s24, %s44_s24 }
  0x1b   :  { %p734_p11 = scmp.ne.s32.totalorder %s44_s24, %s733_s12  ;;  %p739_p13 = scmp.lt.s32.totalorder %s733_s12, %s733_s12 }
  0x1d   :  { %p740_p0 = por %p739_p13, %p738_p12 }
  0x1f   :  { %p741_p1 = pnand %p740_p0, %p734_p11 }
  0x21   :  { %744 = shalt.err (!%p741_p1)
}
  0x22   :  { %s777_s3 = smov 128   ;;  %s778_s10 = smov 8  }
  0x23   :  { %49 = dma.hbm_to_vmem [thread:$0]  %s925_s5, 2048, %s44_s24, [#allocation6], %s777_s3, %s777_s3, %s778_s10  }
  0x24   :  { %767 = dma.done.wait [#allocation3], 1024  }
  0x25   :  { %768 = vsyncadd [#allocation3], 4294966272 }
  0x26   :  { %769 = dma.done.wait [#allocation6], 2048  }
  0x27   :  { %770 = vsyncadd [#allocation6], 4294965248  ;;  %v779_v0 = vmov 0.0   ;;  %vm780_vm0 = vmmov 0   ;;  %v648_v1 = vld [vmem:[%s921_s1] sm:$0xff]   ;;  %v649_v2 = vld [vmem:[%s921_s1 + $0x8] sm:$0xff]   ;;  %v317_v60 = vlaneseq }
  0x28   :  { %598 = vmatprep.subr.bf16.mxu0 %v779_v0  ;;  %614 = vmatprep.mubr.msk.bf16.mxu0 %vm780_vm0, %v779_v0  ;;  %v650_v3 = vld [vmem:[%s921_s1 + $0x10] sm:$0xff]   ;;  %v657_v4 = vld [vmem:[#allocation2] sm:$0xff]   ;;  %v651_v5 = vld [vmem:[%s921_s1 + $0x18] sm:$0xff]   ;;  %v781_v44 = vmov 0  }
  0x29   :  { %618 = vmatprep.subr.bf16.mxu1 %v779_v0  ;;  %634 = vmatprep.mubr.msk.bf16.mxu1 %vm780_vm0, %v779_v0  ;;  %v658_v6 = vld [vmem:[#allocation2 + $0x8] sm:$0xff]   ;;  %v652_v7 = vld [vmem:[%s921_s1 + $0x20] sm:$0xff]   ;;  %v659_v8 = vld [vmem:[#allocation2 + $0x10] sm:$0xff]   ;;  %v318_v61 = vshrl.u32 %v317_v60, 7 }
  0x2a   :  { %599 = vmatpush3.bf16.msra.mxu0 %v648_v1  ;;  %619 = vmatpush3.bf16.msra.mxu1 %v657_v4  ;;  %v653_v9 = vld [vmem:[%s921_s1 + $0x28] sm:$0xff]   ;;  %v660_v10 = vld [vmem:[#allocation2 + $0x18] sm:$0xff]   ;;  %v654_v11 = vld [vmem:[%s921_s1 + $0x30] sm:$0xff]  }
  0x2b   :  { %600 = vmatprep.subr.bf16.mxu0 %v779_v0  ;;  %620 = vmatprep.subr.bf16.mxu1 %v779_v0  ;;  %v661_v12 = vld [vmem:[#allocation2 + $0x20] sm:$0xff]   ;;  %v655_v13 = vld [vmem:[%s921_s1 + $0x38] sm:$0xff]   ;;  %v662_v14 = vld [vmem:[#allocation2 + $0x28] sm:$0xff]   ;;  %v323_v62 = vsub.s32 1, %v318_v61 }
  0x2c   :  { %v656_v15 = vld [vmem:[%s920_s0] sm:$0xff]   ;;  %v663_v16 = vld [vmem:[#allocation2 + $0x30] sm:$0xff]   ;;  %v664_v17 = vld [vmem:[#allocation2 + $0x38] sm:$0xff]  }
  0x2d   :  { %v665_v18 = vld [vmem:[#allocation5] ss:$8 sps:$4 sm:$0xff]   ;;  %v667_v19 = vld [vmem:[#allocation5 + $0x4] ss:$8 sps:$4 sm:$0xff]   ;;  %v670_v20 = vld [vmem:[#allocation5 + $0x14] ss:$8 sps:$4 sm:$0xff]  }
  0x2e   :  { %601 = vmatpush3.bf16.msra.mxu0 %v649_v2  ;;  %621 = vmatpush3.bf16.msra.mxu1 %v658_v6  ;;  %v668_v21 = vld [vmem:[#allocation5 + $0x10] ss:$8 sps:$4 sm:$0xff]   ;;  %v673_v22 = vld [vmem:[#allocation5 + $0x24] ss:$8 sps:$4 sm:$0xff]   ;;  %v671_v23 = vld [vmem:[#allocation5 + $0x20] ss:$8 sps:$4 sm:$0xff]  }
  0x2f   :  { %602 = vmatprep.subr.bf16.mxu0 %v779_v0  ;;  %622 = vmatprep.subr.bf16.mxu1 %v779_v0  ;;  %v676_v24 = vld [vmem:[#allocation5 + $0x34] ss:$8 sps:$4 sm:$0xff]   ;;  %v674_v25 = vld [vmem:[#allocation5 + $0x30] ss:$8 sps:$4 sm:$0xff]   ;;  %v679_v26 = vld [vmem:[#allocation5 + $0x44] ss:$8 sps:$4 sm:$0xff]  }
  0x30   :  { %v677_v27 = vld [vmem:[#allocation5 + $0x40] ss:$8 sps:$4 sm:$0xff]   ;;  %v682_v28 = vld [vmem:[#allocation5 + $0x54] ss:$8 sps:$4 sm:$0xff]   ;;  %v680_v29 = vld [vmem:[#allocation5 + $0x50] ss:$8 sps:$4 sm:$0xff]  }
  0x31   :  { %v541_v30 = vld [vmem:[%s922_s2] ss:$0 sm:$0xff]  ;;  %v685_v40 = vld [vmem:[#allocation5 + $0x64] ss:$8 sps:$4 sm:$0xff]   ;;  %v688_v42 = vld [vmem:[#allocation5 + $0x74] ss:$8 sps:$4 sm:$0xff]  }
  0x32   :  { %603 = vmatpush3.bf16.msra.mxu0 %v650_v3  ;;  %623 = vmatpush3.bf16.msra.mxu1 %v659_v8  ;;  %v683_v41 = vld [vmem:[#allocation5 + $0x60] ss:$8 sps:$4 sm:$0xff]   ;;  %v686_v43 = vld [vmem:[#allocation5 + $0x70] ss:$8 sps:$4 sm:$0xff]  }
  0x33   :  { %604 = vmatprep.subr.bf16.mxu0 %v779_v0  ;;  %624 = vmatprep.subr.bf16.mxu1 %v779_v0  ;;  %v551_v45 = vld [vmem:[%s924_s4] ss:$0 sm:$0xff] }
  0x34   :  { %v577_v55 = vld [vmem:[%s927_s7] sm:$0xff]  }
  0x35   :  { %v578_v56 = vunpack.c.l.bf16 %v577_v55  ;;  %v579_v58 = vunpack.c.h.bf16 %v577_v55  ;;  %v63_v63 = vld [vmem:[%s926_s6] sm:$0x3]  ;;  %s782_s6 = smov [#allocation7]  }
  0x36   :  { %605 = vmatpush3.bf16.msra.mxu0 %v651_v5  ;;  %625 = vmatpush3.bf16.msra.mxu1 %v660_v10  ;;  %s524_s7 = sshll.u32 %s782_s6, 4  ;;  %s525_s7 = int_to_ptr.vmem [resolvable:$true] %s524_s7 }
  0x37   :  { %606 = vmatprep.subr.bf16.mxu0 %v779_v0  ;;  %626 = vmatprep.subr.bf16.mxu1 %v779_v0  ;;  %v505_v57 = vmul.f32 %v578_v56, %v578_v56  ;;  %v506_v59 = vmul.f32 %v579_v58, %v579_v58  ;;  %s745_s16 = scalar_lea.vmem %s525_s7, 256  ;;  %p750_p3 = scmp.lt.s32.totalorder %s525_s7, %s525_s7 }
  0x38   :  { %p746_p2 = scmp.ne.s32.totalorder %s525_s7, %s745_s16  ;;  %p751_p4 = scmp.lt.s32.totalorder %s745_s16, %s745_s16 }
  0x39   :  { %507 = vadd.xlane.f32.xlu0 %v505_v57 }
  0x3a   :  { %607 = vmatpush3.bf16.msra.mxu0 %v652_v7  ;;  %627 = vmatpush3.bf16.msra.mxu1 %v661_v12  ;;  %p752_p5 = por %p751_p4, %p750_p3 }
  0x3b   :  { %608 = vmatprep.subr.bf16.mxu0 %v779_v0  ;;  %628 = vmatprep.subr.bf16.mxu1 %v779_v0 }
  0x3c   :  { %p753_p6 = pnand %p752_p5, %p746_p2 }
  0x3d   :  { %509 = vadd.xlane.f32.xlu0 %v506_v59 }
  0x3e   :  { %609 = vmatpush3.bf16.msra.mxu0 %v653_v9  ;;  %629 = vmatpush3.bf16.msra.mxu1 %v662_v14 }
  0x3f   :  { %610 = vmatprep.subr.bf16.mxu0 %v779_v0  ;;  %630 = vmatprep.subr.bf16.mxu1 %v779_v0 }
  0x42   :  { %611 = vmatpush3.bf16.msra.mxu0 %v654_v11  ;;  %631 = vmatpush3.bf16.msra.mxu1 %v663_v16 }
  0x43   :  { %612 = vmatprep.subr.bf16.mxu0 %v779_v0  ;;  %632 = vmatprep.subr.bf16.mxu1 %v779_v0  ;;  %v324_v0 = vrot.slane %v63_v63, %v323_v62 }
  0x46   :  { %613 = vmatpush3.bf16.msra.mxu0 %v655_v13  ;;  %633 = vmatpush3.bf16.msra.mxu1 %v664_v17 }
  0x47   :  { %407 = vmatprep.subr.bf16.mxu0 %v667_v19 }
  0x49   :  { %615 = vmatmul.mubr.bf16.vlgmr.msra.gmra.mrb[0].mxu0 %v656_v15 }
  0x4a   :  { %408 = vmatpush1.bf16.msra.mxu0 %v665_v18  ;;  %439 = vmatprep.mubr.bf16.mxu0 %v781_v44 }
  0x4b   :  { %409 = vmatprep.subr.bf16.mxu0 %v670_v20 }
  0x4e   :  { %410 = vmatpush1.bf16.msra.mxu0 %v668_v21 }
  0x4f   :  { %411 = vmatprep.subr.bf16.mxu0 %v673_v22 }
  0x52   :  { %412 = vmatpush1.bf16.msra.mxu0 %v671_v23  ;;  %v319_v23 = vsub.s32 0, %v318_v61 }
  0x53   :  { %413 = vmatprep.subr.bf16.mxu0 %v676_v24 }
  0x56   :  { %414 = vmatpush1.bf16.msra.mxu0 %v674_v25 }
  0x57   :  { %415 = vmatprep.subr.bf16.mxu0 %v679_v26 }
  0x5a   :  { %416 = vmatpush1.bf16.msra.mxu0 %v677_v27 }
  0x5b   :  { %417 = vmatprep.subr.bf16.mxu0 %v682_v28 }
  0x5e   :  { %418 = vmatpush1.bf16.msra.mxu0 %v680_v29 }
  0x5f   :  { %419 = vmatprep.subr.bf16.mxu0 %v685_v40 }
  0x62   :  { %420 = vmatpush1.bf16.msra.mxu0 %v683_v41 }
  0x63   :  { %421 = vmatprep.subr.bf16.mxu0 %v688_v42 }
  0x66   :  { %422 = vmatpush1.bf16.msra.mxu0 %v686_v43 }
 0x11c   :  { %v176_v31 = vpop.f32.mrb[0].mxu0 }
 0x11d   :  { %v177_v32 = vadd.f32 %v541_v30, %v176_v31  ;;  %v616_v33 = vpop.f32.mrb[1].mxu0 }
 0x11e   :  { %v179_v34 = vpop.f32.mrb[2].mxu0 }
 0x11f   :  { %v180_v35 = vadd.f32 %v541_v30, %v179_v34  ;;  %v617_v36 = vpop.f32.mrb[3].mxu0  ;;  %v183_v37 = vmax.f32 %v177_v32, 0.0  ;;  %v320_v32 = vrot.slane %v63_v63, %v319_v23 }
 0x121   :  { %v184_v38 = vmax.f32 %v180_v35, 0.0 }
 0x123   :  { %v185_v39 = vpack.c.bf16 %v184_v38, %v183_v37 }
 0x125   :  { %635 = vmatmul.mubr.bf16.vlgmr.msra.gmra.mrb[0].mxu1 %v185_v39 }
 0x1f8   :  { %v290_v46 = vpop.f32.mrb[0].mxu1 }
 0x1f9   :  { %v291_v47 = vadd.f32 %v551_v45, %v290_v46  ;;  %v636_v48 = vpop.f32.mrb[1].mxu1 }
 0x1fa   :  { %v293_v49 = vpop.f32.mrb[2].mxu1 }
 0x1fb   :  { %v294_v50 = vadd.f32 %v551_v45, %v293_v49  ;;  %v637_v51 = vpop.f32.mrb[3].mxu1  ;;  %v297_v52 = vmax.f32 %v291_v47, 0.0  ;;  %v483_v45 = vand.u32 127, %v317_v60 }
 0x1fd   :  { %v298_v53 = vmax.f32 %v294_v50, 0.0  ;;  %vm484_vm3 = vcmp.lt.s32.totalorder %v483_v45, 16 }
 0x1ff   :  { %v299_v54 = vpack.c.bf16 %v298_v53, %v297_v52 }
 0x201   :  { %440 = vmatmul.mubr.bf16.vlgmr.msra.gmra.mrb[4].mxu0 %v299_v54 }
 0x2d4   :  { %v441_v1 = vpop.f32.mrb[4].mxu0 }
 0x2d5   :  { %v443_v2 = vpop.f32.mrb[5].mxu0  ;;  %v442_v38 = vadd.f32 %v441_v1, %v320_v32 }
 0x2d6   :  { %v444_v3 = vadd.f32 %v443_v2, %v324_v0  ;;  %v445_v4 = vpop.f32.mrb[6].mxu0 }
 0x2d7   :  { %v447_v5 = vpop.f32.mrb[7].mxu0  ;;  %v446_v41 = vadd.f32 %v445_v4, %v320_v32 }
 0x2d8   :  { %v452_v6 = vand.u32 2147483647, %v444_v3  ;;  %v448_v7 = vadd.f32 %v447_v5, %v324_v0  ;;  %v450_v28 = vmax.f32 %v444_v3, 0.0 }
 0x2da   :  { %v454_v8 = vsub.f32 0.0, %v452_v6  ;;  %v453_v9 = vand.u32 2147483647, %v448_v7  ;;  %v451_v34 = vmax.f32 %v448_v7, 0.0 }
 0x2dc   :  { %v456_v10 = vmul.f32 1.442695, %v454_v8  ;;  %v455_v11 = vsub.f32 0.0, %v453_v9 }
 0x2de   :  { %689 = vpow2.f32 %v456_v10  ;;  %v458_v12 = vmul.f32 1.442695, %v455_v11 }
 0x2e0   :  { %691 = vpow2.f32 %v458_v12 }
 0x2e8   :  { %v690_v13 = vpop.eup %689 }
 0x2e9   :  { %v460_v14 = vadd.f32 1.0, %v690_v13  ;;  %v463_v17 = vmul.f32 -0.5, %v690_v13  ;;  %v466_v20 = vand.u32 2147483647, %v690_v13 }
 0x2ea   :  { %v692_v15 = vpop.eup %691 }
 0x2eb   :  { %693 = vlog2.f32 %v460_v14  ;;  %v469_v16 = vadd.f32 1.0, %v692_v15  ;;  %v472_v18 = vmul.f32 -0.5, %v692_v15  ;;  %v464_v19 = vadd.f32 1.0, %v463_v17 }
 0x2ec   :  { %v475_v24 = vand.u32 2147483647, %v692_v15  ;;  %vm467_vm1 = vcmp.lt.f32.partialorder %v466_v20, 0.0004427343 }
 0x2ed   :  { %695 = vlog2.f32 %v469_v16  ;;  %v473_v21 = vadd.f32 1.0, %v472_v18  ;;  %v465_v26 = vmul.f32 %v690_v13, %v464_v19 }
 0x2ee   :  { %vm476_vm2 = vcmp.lt.f32.partialorder %v475_v24, 0.0004427343 }
 0x2ef   :  { %v474_v31 = vmul.f32 %v692_v15, %v473_v21 }
 0x2f5   :  { %v694_v22 = vpop.eup %693 }
 0x2f6   :  { %v462_v25 = vmul.f32 0.6931472, %v694_v22 }
 0x2f7   :  { %v696_v27 = vpop.eup %695 }
 0x2f8   :  { %v468_v29 = vsel %vm467_vm1, %v465_v26, %v462_v25  ;;  %v471_v30 = vmul.f32 0.6931472, %v696_v27 }
 0x2f9   :  { %v478_v33 = vadd.f32 %v468_v29, %v450_v28 }
 0x2fa   :  { %v477_v35 = vsel %vm476_vm2, %v474_v31, %v471_v30 }
 0x2fb   :  { %v480_v36 = vmax.f32 %v478_v33, 1e-30  ;;  %v479_v37 = vadd.f32 %v477_v35, %v451_v34 }
 0x2fd   :  { %v481_v39 = vmax.f32 %v479_v37, 1e-30  ;;  %v501_v40 = vmul.f32 %v578_v56, %v480_v36  ;;  %697 = vlog2.f32 %v480_v36 }
 0x2ff   :  { %v502_v42 = vmul.f32 %v579_v58, %v481_v39  ;;  %699 = vlog2.f32 %v481_v39  ;;  %v503_v43 = vadd.f32 %v501_v40, %v442_v38 }
 0x301   :  { %v504_v44 = vadd.f32 %v502_v42, %v446_v41  ;;  %515 = vst [vmem:[#allocation7] sm:$0xff] %v503_v43 }
 0x303   :  { %516 = vst [vmem:[#allocation7 + $0x8] sm:$0xff] %v504_v44 }
 0x307   :  { %v698_v46 = vpop.eup %697 }
 0x308   :  { %v486_v47 = vmul.f32 0.6931472, %v698_v46 }
 0x309   :  { %v700_v48 = vpop.eup %699 }
 0x30a   :  { %v489_v49 = vsub.f32 -0.9189385, %v486_v47  ;;  %v488_v50 = vmul.f32 0.6931472, %v700_v48 }
 0x30c   :  { %v491_v51 = vsel %vm484_vm3, %v489_v49, 0.0  ;;  %v490_v52 = vsub.f32 -0.9189385, %v488_v50 }
 0x30d   :  { %493 = vadd.xlane.f32.xlu1 %v491_v51 }
 0x30e   :  { %v492_v53 = vsel %vm484_vm3, %v490_v52, 0.0 }
 0x311   :  { %495 = vadd.xlane.f32.xlu1 %v492_v53 }
 0x312   :  { %756 = shalt.err (!%p753_p6)
}
 0x313   :  { %s757_s5 = scalar_lea.hbm %s928_s8, 256 }
 0x314   :  { %p758_p7 = scmp.ne.s32.totalorder %s928_s8, %s757_s5  ;;  %p761_p8 = scmp.lt.u32.totalorder %s757_s5, %s928_s8 }
 0x316   :  { %p763_p9 = pnand %p761_p8, %p758_p7 }
 0x318   :  { %766 = shalt.err (!%p763_p9)
}
 0x319   :  { %530 = dma.vmem_to_hbm [thread:$0]  %s525_s7, 256, %s928_s8, [#allocation4], %s777_s3, %s777_s3, %s778_s10   ;;  %v508_v54 = vpop.xlane.xlu0 %507 }
 0x31a   :  { %v511_v55 = vmul.f32 0.5, %v508_v54 }
 0x31d   :  { %v510_v56 = vpop.xlane.xlu0 %509 }
 0x31e   :  { %v512_v59 = vmul.f32 0.5, %v510_v56 }
 0x39a   :  { %v494_v57 = vpop.xlane.xlu1 %493 }
 0x39b   :  { %v513_v58 = vsub.f32 %v494_v57, %v511_v55 }
 0x39d   :  { %517 = vst [vmem:[%s929_s9] sm:$0xff] %v513_v58 }
 0x39e   :  { %v496_v60 = vpop.xlane.xlu1 %495 }
 0x39f   :  { %v514_v61 = vsub.f32 %v496_v60, %v512_v59 }
 0x3a1   :  { %518 = vst [vmem:[%s929_s9 + $0x8] sm:$0xff] %v514_v61 }
 0x3a2   :  { %771 = dma.done.wait [#allocation4], 256  }
 0x3a3   :  { %772 = vsyncadd [#allocation4], 4294967040 }
 0x3a4   :  { %538 = vsyncpa [#allocation3], 1 }
 0x3a5   :  { %539 = vsyncpa [#allocation6], 1 }
 0x3a6   :  { %540 = vsyncpa [#allocation4], 1 }

</bundles_post_ra>
